<compile_context>
chip_gen: v6e
topology: v6e:2x2x1
jax: 0.10.0
libtpu: 0.0.40
codegen_flags: <defaults>
</compile_context>

<pallas_src>
import functools

import jax
import jax.numpy as jnp
from jax import lax
from jax.experimental import pallas as pl
from jax.experimental.pallas import tpu as pltpu


def _round_up(x, m):
    return (x + m - 1) // m * m


def _pick_tile(hw_pad):
    # Largest lane-dense tile (multiple of 128, <= 512) that divides hw_pad.
    for t in (512, 384, 256, 128):
        if hw_pad % t == 0:
            return t
    return 128


# --------------------------------------------------------------------------------------
# Pass 1: per j-tile, compute the g 1x1 conv and the folded theta / phi rows once.
# --------------------------------------------------------------------------------------
def precompute_kernel(x1_ref, x2_ref, wg_ref, bg_ref, wt_ref, wp_ref, bt_ref,
                      g_ref, trow_ref, prow_ref, *, hw_true, mask_j):
    j = pl.program_id(1)

    x1 = x1_ref[...]                          # (C, Tj)  branch_one tile
    x2 = x2_ref[...]                          # (C, Tj)  branch_two tile
    tj = x1.shape[-1]

    # g 1x1 conv: (IC, Tj).  Stored in bf16 on the fast path (g_ref dtype).
    g = jnp.dot(wg_ref[...], x1, preferred_element_type=jnp.float32) + bg_ref[...]
    g_ref[...] = g.astype(g_ref.dtype)

    # Folded theta row (includes the W_f theta-half, all biases and 1/HW).
    trow_ref[...] = (jnp.dot(wt_ref[...], x1, preferred_element_type=jnp.float32)
                     + bt_ref[0, 0])

    # Folded phi row (W_f phi-half + 1/HW).  Padded columns are pushed to -1e30 so the
    # downstream relu zeroes their contribution.
    p = jnp.dot(wp_ref[...], x2, preferred_element_type=jnp.float32)
    if mask_j:
        col = lax.broadcasted_iota(jnp.int32, (1, tj), 1) + j * tj
        p = jnp.where(col < hw_true, p, jnp.float32(-1e30))
    prow_ref[...] = p


# --------------------------------------------------------------------------------------
# Pass 2: streaming attention accumulation + W_z/BN epilogue + residual.
# --------------------------------------------------------------------------------------
def cross_atn_kernel(x1i_ref, g_ref, trow_ref, prow_ref, wz_ref, bz_ref,
                     out_ref, acc_ref):
    j = pl.program_id(2)

    @pl.when(j == 0)
    def _init():
        acc_ref[...] = jnp.zeros_like(acc_ref)

    t_row = trow_ref[...]                     # (1, Ti) f32
    p_row = prow_ref[...]                     # (1, Tj) f32
    p_col = jnp.transpose(p_row)              # (Tj, 1) — only O(Tj) crosses lanes

    # fT tile (Tj, Ti): rows = phi index j, cols = theta index i.  relu/add already
    # includes the 1/HW scale and the W_f bias (inside t_row).
    fT = jnp.maximum(p_col + t_row, 0.0)      # (Tj, Ti) f32 on the VPU

    g_j = g_ref[...]                          # (IC, Tj), bf16 or f32
    acc_ref[...] += jnp.dot(g_j, fT.astype(g_j.dtype),
                            preferred_element_type=jnp.float32)     # (IC, Ti)

    @pl.when(j == pl.num_programs(2) - 1)
    def _finalize():
        # W_z (with eval-mode BatchNorm folded in) + residual; kept in f32.
        wy = jnp.dot(wz_ref[...], acc_ref[...],
                     preferred_element_type=jnp.float32) + bz_ref[...]   # (C, Ti)
        out_ref[...] = (wy + x1i_ref[...]).astype(out_ref.dtype)


def cross_atn_block(branch_one, branch_two, params, *, use_bf16=True):
    N, C, H, W = branch_one.shape
    HW = H * W
    IC = params["wg"].shape[0]

    HW_pad = _round_up(HW, 128)
    tile = _pick_tile(HW_pad)
    Ti = Tj = tile
    nI = HW_pad // Ti
    nJ = HW_pad // Tj

    x1f = branch_one.reshape(N, C, HW).astype(jnp.float32)
    x2f = branch_two.reshape(N, C, HW).astype(jnp.float32)
    if HW_pad != HW:
        pad = ((0, 0), (0, 0), (0, HW_pad - HW))
        x1f = jnp.pad(x1f, pad)
        x2f = jnp.pad(x2f, pad)

    # Fold W_f (theta/phi halves) + 1/HW into effective theta/phi row weights.
    inv_hw = jnp.float32(1.0 / HW)
    wt_eff = (params["wft"] @ params["wth"]) * inv_hw                       # (1, C)
    wp_eff = (params["wfp"] @ params["wph"]) * inv_hw                       # (1, C)
    bt_eff = (params["wft"] @ params["bth"] + params["wfp"] @ params["bph"]
              + params["bf"]) * inv_hw                                      # (1, 1) -> SMEM

    # Fold eval-mode BatchNorm into W_z.
    eps = 1e-5
    scale = params["gamma"] * lax.rsqrt(params["rvar"] + eps)               # (C, 1)
    wz_eff = scale * params["wz"]                                           # (C, IC)
    bz_eff = scale * (params["bz"] - params["rmean"]) + params["beta"]      # (C, 1)

    g_dtype = jnp.bfloat16 if use_bf16 else jnp.float32
    vmem_lim = 48 * 1024 * 1024

    # ------------------------------- pass 1 --------------------------------------
    pre_kernel = functools.partial(precompute_kernel,
                                   hw_true=HW, mask_j=(HW_pad != HW))

    def _w2(shape):
        nd = len(shape)
        return pl.BlockSpec(shape, lambda n, j, _nd=nd: (0,) * _nd)

    g_arr, t_arr, p_arr = pl.pallas_call(
        pre_kernel,
        out_shape=(jax.ShapeDtypeStruct((N, IC, HW_pad), g_dtype),
                   jax.ShapeDtypeStruct((N, 1, HW_pad), jnp.float32),
                   jax.ShapeDtypeStruct((N, 1, HW_pad), jnp.float32)),
        grid=(N, nJ),
        in_specs=[
            pl.BlockSpec((None, C, Tj), lambda n, j: (n, 0, j)),   # branch_one tile
            pl.BlockSpec((None, C, Tj), lambda n, j: (n, 0, j)),   # branch_two tile
            _w2((IC, C)), _w2((IC, 1)),                            # wg, bg
            _w2((1, C)), _w2((1, C)),                              # wt_eff, wp_eff
            pl.BlockSpec(memory_space=pltpu.SMEM),                 # bt_eff scalar
        ],
        out_specs=(pl.BlockSpec((None, IC, Tj), lambda n, j: (n, 0, j)),
                   pl.BlockSpec((None, 1, Tj), lambda n, j: (n, 0, j)),
                   pl.BlockSpec((None, 1, Tj), lambda n, j: (n, 0, j))),
        compiler_params=pltpu.CompilerParams(
            dimension_semantics=("parallel", "parallel"),
            vmem_limit_bytes=vmem_lim),
    )(x1f, x2f, params["wg"], params["bg"], wt_eff, wp_eff, bt_eff)

    # ------------------------------- pass 2 --------------------------------------
    def _w3(shape):
        nd = len(shape)
        return pl.BlockSpec(shape, lambda n, i, j, _nd=nd: (0,) * _nd)

    out = pl.pallas_call(
        cross_atn_kernel,
        out_shape=jax.ShapeDtypeStruct((N, C, HW_pad), jnp.float32),
        grid=(N, nI, nJ),
        in_specs=[
            pl.BlockSpec((None, C, Ti), lambda n, i, j: (n, 0, i)),    # x1, i tile (residual)
            pl.BlockSpec((None, IC, Tj), lambda n, i, j: (n, 0, j)),   # g, j tile
            pl.BlockSpec((None, 1, Ti), lambda n, i, j: (n, 0, i)),    # theta row, i tile
            pl.BlockSpec((None, 1, Tj), lambda n, i, j: (n, 0, j)),    # phi row, j tile
            _w3((C, IC)), _w3((C, 1)),                                 # wz_eff, bz_eff
        ],
        out_specs=pl.BlockSpec((None, C, Ti), lambda n, i, j: (n, 0, i)),
        scratch_shapes=[pltpu.VMEM((IC, Ti), jnp.float32)],
        compiler_params=pltpu.CompilerParams(
            dimension_semantics=("parallel", "parallel", "arbitrary"),
            vmem_limit_bytes=vmem_lim),
    )(x1f, g_arr, t_arr, p_arr, wz_eff, bz_eff)

    return out[..., :HW].reshape(N, C, H, W)


def make_params(key, in_channels, inter_channels):
    C, IC = in_channels, inter_channels
    ks = jax.random.split(key, 12)
    u = lambda k, shape, fan_in: jax.random.uniform(
        k, shape, jnp.float32, -1.0 / jnp.sqrt(fan_in), 1.0 / jnp.sqrt(fan_in))
    params = {
        "wg":  u(ks[0], (IC, C), C), "bg":  u(ks[1], (IC, 1), C),
        "wth": u(ks[2], (IC, C), C), "bth": u(ks[3], (IC, 1), C),
        "wph": u(ks[4], (IC, C), C), "bph": u(ks[5], (IC, 1), C),
        # W_f: Conv2d(2*IC -> 1, k=1); split its weight into theta / phi halves.
        "wft": u(ks[6], (1, IC), 2 * IC), "wfp": u(ks[7], (1, IC), 2 * IC),
        "bf":  u(ks[8], (1, 1), 2 * IC),
        "wz":  u(ks[9], (C, IC), IC), "bz": u(ks[10], (C, 1), IC),
        # BatchNorm2d init per the module: weight=0, bias=0; running stats default.
        "gamma": jnp.zeros((C, 1), jnp.float32),
        "beta":  jnp.zeros((C, 1), jnp.float32),
        "rmean": jnp.zeros((C, 1), jnp.float32),
        "rvar":  jnp.ones((C, 1), jnp.float32),
    }
    return params


def reference(branch_one, branch_two, p):
    # Pure-JAX reference of the original (unfolded) math, for correctness checking.
    N, C, H, W = branch_one.shape
    HW = H * W
    x1 = branch_one.reshape(N, C, HW)
    x2 = branch_two.reshape(N, C, HW)
    g  = jnp.einsum('ic,ncs->nis', p["wg"],  x1) + p["bg"][None]
    th = jnp.einsum('ic,ncs->nis', p["wth"], x1) + p["bth"][None]
    ph = jnp.einsum('ic,ncs->nis', p["wph"], x2) + p["bph"][None]
    t  = jnp.einsum('oi,nis->nos', p["wft"], th)[:, 0]    # (N, HW)
    pp = jnp.einsum('oi,nis->nos', p["wfp"], ph)[:, 0]    # (N, HW)
    f = jax.nn.relu(t[:, :, None] + pp[:, None, :] + p["bf"][0, 0])   # (N, HW, HW)
    f_div = f / HW
    g_x = jnp.transpose(g, (0, 2, 1))                     # (N, HW, IC)
    y = jnp.einsum('nij,njc->nic', f_div, g_x)            # (N, HW, IC)
    y_t = jnp.transpose(y, (0, 2, 1))                     # (N, IC, HW)
    wy = jnp.einsum('ci,nis->ncs', p["wz"], y_t) + p["bz"][None]
    bn = (wy - p["rmean"][None]) / jnp.sqrt(p["rvar"][None] + 1e-5) * p["gamma"][None] + p["beta"][None]
    return (bn + x1).reshape(N, C, H, W)


if __name__ == "__main__":
    # Small demo shapes, with IC a multiple of 8 (sublane-friendly):
    # in_channels=16 -> inter_channels=8 (module default in_channels // 2).
    N, C, H, W = 2, 16, 8, 8
    IC = C // 2

    key = jax.random.PRNGKey(0)
    kx1, kx2, kp, kb = jax.random.split(key, 4)
    branch_one = jax.random.normal(kx1, (N, C, H, W), jnp.float32)
    branch_two = jax.random.normal(kx2, (N, C, H, W), jnp.float32)
    params = make_params(kp, C, IC)

    # The module initializes BN gamma=beta=0, which zeroes the whole W_z branch and
    # would leave the attention math untested.  Randomize the (eval-mode) BN params
    # so the numerical check exercises the full path end to end.
    kb1, kb2, kb3, kb4 = jax.random.split(kb, 4)
    params["gamma"] = jax.random.normal(kb1, (C, 1), jnp.float32)
    params["beta"] = jax.random.normal(kb2, (C, 1), jnp.float32)
    params["rmean"] = 0.1 * jax.random.normal(kb3, (C, 1), jnp.float32)
    params["rvar"] = jax.random.uniform(kb4, (C, 1), jnp.float32, minval=0.5, maxval=1.5)

    z_ref = reference(branch_one, branch_two, params)

    # Pure-f32 MXU path (tight tolerance).
    z32 = jax.block_until_ready(cross_atn_block(branch_one, branch_two, params, use_bf16=False))
    assert z32.shape == (N, C, H, W)
    err32 = float(jnp.max(jnp.abs(z32 - z_ref)))
    assert jnp.allclose(z32, z_ref, atol=2e-3, rtol=2e-3), err32

    # bf16 g/fT MXU path (v6e/v7x-preferred; accumulation and epilogue stay f32).
    zbf = jax.block_until_ready(cross_atn_block(branch_one, branch_two, params, use_bf16=True))
    errbf = float(jnp.max(jnp.abs(zbf - z_ref)))
    assert jnp.allclose(zbf, z_ref, atol=2e-2, rtol=2e-2), errbf

    print("KERNEL_OK")
</pallas_src>

<mosaic_0001>
module attributes {stable_mosaic.version = 11 : i64} {
  func.func @precompute_kernel(%arg0: i32, %arg1: i32, %arg2: memref<1x16x128xf32, #tpu.memory_space<vmem>>, %arg3: memref<1x16x128xf32, #tpu.memory_space<vmem>>, %arg4: memref<8x16xf32, #tpu.memory_space<vmem>>, %arg5: memref<8x1xf32, #tpu.memory_space<vmem>>, %arg6: memref<1x16xf32, #tpu.memory_space<vmem>>, %arg7: memref<1x16xf32, #tpu.memory_space<vmem>>, %arg8: memref<1x1xf32, #tpu.memory_space<smem>>, %arg9: memref<1x8x128xf32, #tpu.memory_space<vmem>>, %arg10: memref<1x1x128xf32, #tpu.memory_space<vmem>>, %arg11: memref<1x1x128xf32, #tpu.memory_space<vmem>>) attributes {dimension_semantics = [#tpu.dimension_semantics<parallel>, #tpu.dimension_semantics<parallel>], iteration_bounds = array<i64: 2, 1>, scalar_prefetch = 0 : i64, scratch_operands = 0 : i64, tpu.core_type = #tpu.core_type<tc>, window_params = [{transform_indices = @transform_0, window_bounds = array<i64: 1, 16, 128>}, {transform_indices = @transform_1, window_bounds = array<i64: 1, 16, 128>}, {pipeline_mode = #tpu.pipeline_mode<synchronous>, transform_indices = @transform_2, window_bounds = array<i64: 8, 16>}, {pipeline_mode = #tpu.pipeline_mode<synchronous>, transform_indices = @transform_3, window_bounds = array<i64: 8, 1>}, {pipeline_mode = #tpu.pipeline_mode<synchronous>, transform_indices = @transform_4, window_bounds = array<i64: 1, 16>}, {pipeline_mode = #tpu.pipeline_mode<synchronous>, transform_indices = @transform_5, window_bounds = array<i64: 1, 16>}, {transform_indices = @transform_6, window_bounds = array<i64: 1, 1>}, {transform_indices = @transform_7, window_bounds = array<i64: 1, 8, 128>}, {transform_indices = @transform_8, window_bounds = array<i64: 1, 1, 128>}, {transform_indices = @transform_9, window_bounds = array<i64: 1, 1, 128>}]} {
    %c0 = arith.constant 0 : index
    %c0_0 = arith.constant 0 : index
    %c0_1 = arith.constant 0 : index
    %0 = vector.load %arg2[%c0, %c0_0, %c0_1] : memref<1x16x128xf32, #tpu.memory_space<vmem>>, vector<1x16x128xf32>
    %1 = vector.shape_cast %0 : vector<1x16x128xf32> to vector<16x128xf32>
    %c0_2 = arith.constant 0 : index
    %c0_3 = arith.constant 0 : index
    %c0_4 = arith.constant 0 : index
    %2 = vector.load %arg3[%c0_2, %c0_3, %c0_4] : memref<1x16x128xf32, #tpu.memory_space<vmem>>, vector<1x16x128xf32>
    %3 = vector.shape_cast %2 : vector<1x16x128xf32> to vector<16x128xf32>
    %c0_5 = arith.constant 0 : index
    %c0_6 = arith.constant 0 : index
    %4 = vector.load %arg4[%c0_5, %c0_6] : memref<8x16xf32, #tpu.memory_space<vmem>>, vector<8x16xf32>
    %cst = arith.constant dense<0.000000e+00> : vector<8x128xf32>
    %5 = tpu.matmul %4, %1, %cst {dimension_numbers = #tpu.dot_dimension_numbers<[1], [0], [0], [1], [0, 0, 1, 1], [], []>} : vector<8x16xf32>, vector<16x128xf32>, vector<8x128xf32> -> vector<8x128xf32>
    %c0_7 = arith.constant 0 : index
    %c0_8 = arith.constant 0 : index
    %6 = vector.load %arg5[%c0_7, %c0_8] : memref<8x1xf32, #tpu.memory_space<vmem>>, vector<8x1xf32>
    %7 = vector.broadcast %6 : vector<8x1xf32> to vector<8x128xf32>
    %8 = arith.addf %5, %7 : vector<8x128xf32>
    %c0_9 = arith.constant 0 : index
    %c0_10 = arith.constant 0 : index
    %c0_11 = arith.constant 0 : index
    %9 = vector.load %arg9[%c0_9, %c0_10, %c0_11] : memref<1x8x128xf32, #tpu.memory_space<vmem>>, vector<1x8x128xf32>
    %10 = vector.shape_cast %9 : vector<1x8x128xf32> to vector<8x128xf32>
    %11 = vector.shape_cast %8 : vector<8x128xf32> to vector<1x8x128xf32>
    tpu.vector_store %arg9[%c0_9, %c0_10, %c0_11], %11 {strides = array<i32>} : memref<1x8x128xf32, #tpu.memory_space<vmem>>, vector<1x8x128xf32>,
    %c0_12 = arith.constant 0 : index
    %c0_13 = arith.constant 0 : index
    %12 = vector.load %arg6[%c0_12, %c0_13] : memref<1x16xf32, #tpu.memory_space<vmem>>, vector<1x16xf32>
    %cst_14 = arith.constant dense<0.000000e+00> : vector<1x128xf32>
    %13 = tpu.matmul %12, %1, %cst_14 {dimension_numbers = #tpu.dot_dimension_numbers<[1], [0], [0], [1], [0, 0, 1, 1], [], []>} : vector<1x16xf32>, vector<16x128xf32>, vector<1x128xf32> -> vector<1x128xf32>
    %c0_15 = arith.constant 0 : index
    %c0_16 = arith.constant 0 : index
    %14 = memref.load %arg8[%c0_15, %c0_16] : memref<1x1xf32, #tpu.memory_space<smem>>
    %15 = vector.broadcast %14 : f32 to vector<1x128xf32>
    %16 = arith.addf %13, %15 : vector<1x128xf32>
    %c0_17 = arith.constant 0 : index
    %c0_18 = arith.constant 0 : index
    %c0_19 = arith.constant 0 : index
    %17 = vector.load %arg10[%c0_17, %c0_18, %c0_19] : memref<1x1x128xf32, #tpu.memory_space<vmem>>, vector<1x1x128xf32>
    %18 = vector.shape_cast %17 : vector<1x1x128xf32> to vector<1x128xf32>
    %19 = vector.shape_cast %16 : vector<1x128xf32> to vector<1x1x128xf32>
    tpu.vector_store %arg10[%c0_17, %c0_18, %c0_19], %19 {strides = array<i32>} : memref<1x1x128xf32, #tpu.memory_space<vmem>>, vector<1x1x128xf32>,
    %c0_20 = arith.constant 0 : index
    %c0_21 = arith.constant 0 : index
    %20 = vector.load %arg7[%c0_20, %c0_21] : memref<1x16xf32, #tpu.memory_space<vmem>>, vector<1x16xf32>
    %cst_22 = arith.constant dense<0.000000e+00> : vector<1x128xf32>
    %21 = tpu.matmul %20, %3, %cst_22 {dimension_numbers = #tpu.dot_dimension_numbers<[1], [0], [0], [1], [0, 0, 1, 1], [], []>} : vector<1x16xf32>, vector<16x128xf32>, vector<1x128xf32> -> vector<1x128xf32>
    %22 = tpu.iota {dimensions = array<i32: 1>} : vector<1x128xi32>
    %c128_i32 = arith.constant 128 : i32
    %23 = arith.muli %arg1, %c128_i32 : i32
    %24 = vector.broadcast %23 : i32 to vector<1x128xi32>
    %25 = arith.addi %22, %24 : vector<1x128xi32>
    %c64_i32 = arith.constant 64 : i32
    %26 = vector.broadcast %c64_i32 : i32 to vector<1x128xi32>
    %27 = arith.cmpi slt, %25, %26 : vector<1x128xi32>
    %cst_23 = arith.constant -1.000000e+30 : f32
    %28 = vector.broadcast %cst_23 : f32 to vector<1x128xf32>
    %29 = arith.select %27, %21, %28 : vector<1x128xi1>, vector<1x128xf32>
    %c0_24 = arith.constant 0 : index
    %c0_25 = arith.constant 0 : index
    %c0_26 = arith.constant 0 : index
    %30 = vector.load %arg11[%c0_24, %c0_25, %c0_26] : memref<1x1x128xf32, #tpu.memory_space<vmem>>, vector<1x1x128xf32>
    %31 = vector.shape_cast %30 : vector<1x1x128xf32> to vector<1x128xf32>
    %32 = vector.shape_cast %29 : vector<1x128xf32> to vector<1x1x128xf32>
    tpu.vector_store %arg11[%c0_24, %c0_25, %c0_26], %32 {strides = array<i32>} : memref<1x1x128xf32, #tpu.memory_space<vmem>>, vector<1x1x128xf32>,
    return
  }
  func.func @transform_0(%arg0: i32, %arg1: i32) -> (i32, i32, i32) {
    %c0_i32 = arith.constant 0 : i32
    %c0_i32_0 = arith.constant 0 : i32
    return %arg0, %c0_i32, %arg1 : i32, i32, i32
  }
  func.func @transform_1(%arg0: i32, %arg1: i32) -> (i32, i32, i32) {
    %c0_i32 = arith.constant 0 : i32
    %c0_i32_0 = arith.constant 0 : i32
    return %arg0, %c0_i32, %arg1 : i32, i32, i32
  }
  func.func @transform_2(%arg0: i32, %arg1: i32) -> (i32, i32) {
    %c0_i32 = arith.constant 0 : i32
    %c0_i32_0 = arith.constant 0 : i32
    %c0_i32_1 = arith.constant 0 : i32
    return %c0_i32, %c0_i32_0 : i32, i32
  }
  func.func @transform_3(%arg0: i32, %arg1: i32) -> (i32, i32) {
    %c0_i32 = arith.constant 0 : i32
    %c0_i32_0 = arith.constant 0 : i32
    %c0_i32_1 = arith.constant 0 : i32
    return %c0_i32, %c0_i32_0 : i32, i32
  }
  func.func @transform_4(%arg0: i32, %arg1: i32) -> (i32, i32) {
    %c0_i32 = arith.constant 0 : i32
    %c0_i32_0 = arith.constant 0 : i32
    %c0_i32_1 = arith.constant 0 : i32
    return %c0_i32, %c0_i32_0 : i32, i32
  }
  func.func @transform_5(%arg0: i32, %arg1: i32) -> (i32, i32) {
    %c0_i32 = arith.constant 0 : i32
    %c0_i32_0 = arith.constant 0 : i32
    %c0_i32_1 = arith.constant 0 : i32
    return %c0_i32, %c0_i32_0 : i32, i32
  }
  func.func @transform_6(%arg0: i32, %arg1: i32) -> (i32, i32) {
    %c0_i32 = arith.constant 0 : i32
    %c0_i32_0 = arith.constant 0 : i32
    %c0_i32_1 = arith.constant 0 : i32
    return %c0_i32, %c0_i32_0 : i32, i32
  }
  func.func @transform_7(%arg0: i32, %arg1: i32) -> (i32, i32, i32) {
    %c0_i32 = arith.constant 0 : i32
    %c0_i32_0 = arith.constant 0 : i32
    return %arg0, %c0_i32, %arg1 : i32, i32, i32
  }
  func.func @transform_8(%arg0: i32, %arg1: i32) -> (i32, i32, i32) {
    %c0_i32 = arith.constant 0 : i32
    %c0_i32_0 = arith.constant 0 : i32
    return %arg0, %c0_i32, %arg1 : i32, i32, i32
  }
  func.func @transform_9(%arg0: i32, %arg1: i32) -> (i32, i32, i32) {
    %c0_i32 = arith.constant 0 : i32
    %c0_i32_0 = arith.constant 0 : i32
    return %arg0, %c0_i32, %arg1 : i32, i32, i32
  }
}

</mosaic_0001>

<bundles_post_ra>
// kernel: tpu_custom_call.1
= control target key start
LH: loop header
LB: loop body
LE: loop exit
PB: predicated region body
PF: predicated region fallthrough
CT: control target
= control target key end

     0   :  { %s1563_s0 = inlined_call_operand.hbm [shape: f32[2,16,128], index: 0, kind: input, shape index: {}]   ;;  %s1564_s1 = inlined_call_operand.hbm [shape: f32[2,16,128], index: 1, kind: input, shape index: {}]   ;;  %s1565_s2 = inlined_call_operand.vmem [shape: f32[8,16], index: 2, kind: input, shape index: {}]   ;;  %s1566_s3 = inlined_call_operand.vmem [shape: f32[8,1], index: 3, kind: input, shape index: {}]   ;;  %s1567_s4 = inlined_call_operand.vmem [shape: f32[1,16], index: 4, kind: input, shape index: {}]   ;;  %s1568_s5 = inlined_call_operand.vmem [shape: f32[1,16], index: 5, kind: input, shape index: {}]   ;;  %s1569_s6 = inlined_call_operand.<no memory space> [shape: f32[1,1], index: 6, kind: input, shape index: {}]   ;;  %s1570_s7 = inlined_call_operand.hbm [shape: f32[2,8,128], index: 7, kind: output, shape index: {0}]   ;;  %s1571_s8 = inlined_call_operand.hbm [shape: f32[2,1,128], index: 8, kind: output, shape index: {1}]   ;;  %s1572_s9 = inlined_call_operand.hbm [shape: f32[2,1,128], index: 9, kind: output, shape index: {2}]  }
   0x1   :  { %1581 = sst [smem:[#allocation21_spill]] %s1563_s0 }
   0x2   :  { %1582 = sst [smem:[#allocation22_spill]] %s1572_s9 }
   0x3   :  { %15 = sst [smem:[#allocation2]] %s1569_s6 }
   0x4   :  { %16 = vsyncpa [#allocation4], 0 }
   0x5   :  { %18 = vsyncpa [#allocation4 + $0x1], 0 }
   0x6   :  { %19 = vsyncpa [#allocation7], 0 }
   0x7   :  { %21 = vsyncpa [#allocation7 + $0x1], 0 }
   0x8   :  { %22 = vsyncpa [#allocation5], 0 }
   0x9   :  { %24 = vsyncpa [#allocation5 + $0x1], 0 }
   0xa   :  { %25 = vsyncpa [#allocation10], 0 }
   0xb   :  { %27 = vsyncpa [#allocation10 + $0x1], 0  ;;  %s1288_s11 = smov 0   ;;  %s1290_s12 = smov 0  }
   0xc   :  { %s1292_s13 = smov 0   ;;  %s1294_s14 = smov 0  }
   0xd   :  { %s1296_s15 = smov 0   ;;  %s1298_s16 = smov 0  }
   0xe LB: > { %1583 = sst [smem:[#allocation16_spill]] %s1203_s11  ;;  %s1319_s6 = sadd.s32 4294967295, %s1223_s16   ;;  %s1223_s16 = sphi %s1298_s16, %s33_s16   ;;  %s1219_s15 = sphi %s1296_s15, %s1607_s15   ;;  %s1215_s14 = sphi %s1294_s14, %s1606_s14   ;;  %s1211_s13 = sphi %s1292_s13, %s1602_s13   ;;  %s1207_s12 = sphi %s1290_s12, %s1605_s12   ;;  %s1203_s11 = sphi %s1288_s11, %s1604_s11  }
   0xf   : > { %1584 = sst [smem:[#allocation17_spill]] %s1211_s13  ;;  %s1573_s17 = sadd.s32 4294967294, %s1223_s16  }
  0x10   : > { %s45_s18 = sadd.s32 1, %s1219_s15  ;;  %s54_s19 = sadd.s32 1, %s1211_s13 }
  0x11   : > { %p47_p0 = scmp.ge.s32.totalorder %s45_s18, 2  ;;  %p61_p1 = scmp.ne.s32.totalorder %s1211_s13, %s1207_s12 }
  0x12   : > { %p62_p2 = scmp.eq.s32.totalorder %s1223_s16, 0  ;;  %p67_p3 = scmp.ne.s32.totalorder %s1207_s12, %s1203_s11 }
  0x13   : > { %s1609_s18 = smov (%p47_p0, %s45_s18), 0  ;;  %p68_p5 = scmp.eq.s32.totalorder %s1319_s6, 0 }
  0x14   : > { %1585 = sst [smem:[#allocation18_spill]] %s1609_s18  ;;  %p1331_p4 = por %p62_p2, %p61_p1 }
  0x15   : > { %s49_s21 = ssub.s32 %s1219_s15, %s1609_s18  ;;  %p226_p6 = scmp.eq.s32.totalorder %s1319_s6, 1 }
  0x16   : > { %p52_p7 = scmp.eq.s32.totalorder %s49_s21, 0  ;;  %p1339_p8 = por %p68_p5, %p67_p3 }
  0x17   : > { %p1343_p9 = por %p226_p6, %p61_p1  ;;  %p232_p10 = scmp.eq.s32.totalorder %s1573_s17, 1 }
  0x18   : > { %s1350_s24 = scalar_select %p52_p7, %s1211_s13, %s54_s19  }
  0x19   : > { %p1352_p11 = por %p232_p10, %p67_p3  ;;  %p892_p12 = scmp.ge.s32.totalorder %s1223_s16, 2 }
  0x1a   : > { %1589 = sst [smem:[#allocation19_spill]] %s1350_s24  ;;  %p971_p13 = scmp.lt.s32.totalorder %s1223_s16, 2 }
  0x1b   : > { %s1590_s25 = scalar_select %p1352_p11, 1, 0 }
  0x1c   : > { %s1359_s26 = sand.u32 1, %s1211_s13   ;;  %s912_s28 = sshll.u32 %s1219_s15, 8 }
  0x1d   : > { %1591 = sst [smem:[#allocation20_spill]] %s1590_s25  ;;  %s1575_s27 = sshll.u32 %s1359_s26, 4 }
  0x1e   : > { %s1592_s0 = sld [smem:[#allocation21_spill]]  ;;  %s327_s19 = scalar_lea.vmem [#allocation3], %s1575_s27 }
  0x1f   : > { %s335_s21 = sshll.u32 %s327_s19, 4  ;;  %p1372_p0 = pnand %p971_p13, %p1331_p4  ;;  %s336_s21 = int_to_ptr.vmem [resolvable:$true] %s335_s21 }
  0x20   : > { %p899_p1 = scmp.ge.s32.totalorder %s1223_s16, 1  ;;  %s324_s18 = scalar_lea.sflag [#allocation4], %s1359_s26 }
  0x21   : > { %p1029_p2 = pneg %p1372_p0  ;;  %s1040_s24 = scalar_lea.vmem %s336_s21, 256 }
  0x22   : > { %p1041_p3 = scmp.ne.s32.totalorder %s336_s21, %s1040_s24  ;;  %s1225_s29 = smov [#allocation3]  }
  0x23   : > { %s1045_s30 = sshll.u32 %s1225_s29, 4  ;;  %s1046_s30 = int_to_ptr.vmem [resolvable:$false] %s1045_s30 }
  0x24   : > { %s334_s10 = scalar_lea.hbm %s1592_s0, %s912_s28  ;;  %p1043_p5 = pnand %p1041_p3, %p1029_p2 }
  0x25   : > { %s1047_s20 = scalar_lea.vmem %s1046_s30, 512  ;;  %p1048_p4 = scmp.lt.s32.totalorder %s336_s21, %s1046_s30 }
  0x26   : > { %p1044_p6 = pneg %p1043_p5  ;;  %p1049_p7 = scmp.lt.s32.totalorder %s1047_s20, %s1040_s24 }
  0x28   : > { %p1050_p10 = por %p1049_p7, %p1048_p4 }
  0x2a   : > { %p1051_p13 = pnand %p1050_p10, %p1044_p6 }
  0x2c   : > { %1054 = shalt.err (!%p1051_p13)
}
  0x2d   : > { %s1226_s19 = smov 128   ;;  %s1227_s27 = smov 8  }
  0x2e   : > { %957 = dma.hbm_to_vmem [thread:$0]  (!%p1372_p0), %s334_s10, 256, %s336_s21, %s324_s18, %s1226_s19, %s1226_s19, %s1227_s27  }
  0x2f   : > { %p365_p3 = scmp.lt.s32.totalorder %s1223_s16, 3  ;;  %s356_s24 = scalar_lea.hbm %s1564_s1, %s912_s28 }
  0x30   : > { %s1595_s20 = sshll.u32 %s1359_s26, 4  ;;  %s346_s11 = scalar_lea.sflag [#allocation7], %s1359_s26 }
  0x31   : > { %p1393_p5 = pnand %p899_p1, %p365_p3  ;;  %s349_s13 = scalar_lea.vmem [#allocation6], %s1595_s20 }
  0x32   : > { %s357_s25 = sshll.u32 %s349_s13, 4  ;;  %s1228_s18 = smov [#allocation6]   ;;  %s358_s25 = int_to_ptr.vmem [resolvable:$true] %s357_s25 }
  0x33   : > { %s1068_s9 = scalar_lea.vmem %s358_s25, 256  ;;  %s1073_s10 = sshll.u32 %s1228_s18, 4  ;;  %s1074_s10 = int_to_ptr.vmem [resolvable:$false] %s1073_s10 }
  0x34   : > { %p1069_p6 = scmp.ne.s32.totalorder %s358_s25, %s1068_s9  ;;  %s1075_s0 = scalar_lea.vmem %s1074_s10, 512 }
  0x35   : > { %p1076_p10 = scmp.lt.s32.totalorder %s358_s25, %s1074_s10  ;;  %p1077_p1 = scmp.lt.s32.totalorder %s1075_s0, %s1068_s9 }
  0x36   : > { %p1071_p4 = pnand %p1069_p6, %p1029_p2 }
  0x37   : > { %p1078_p13 = por %p1077_p1, %p1076_p10 }
  0x38   : > { %p1072_p7 = pneg %p1071_p4 }
  0x3a   : > { %p1079_p3 = pnand %p1078_p13, %p1072_p7 }
  0x3c   : > { %1082 = shalt.err (!%p1079_p3)
}
  0x3d   : > { %960 = dma.hbm_to_vmem [thread:$0]  (!%p1372_p0), %s356_s24, 256, %s358_s25, %s346_s11, %s1226_s19, %s1226_s19, %s1227_s27  }
  0x3e   : > { %369 = sbr.rel (%p1393_p5) target bundleno = 334 (0x14e), region = 48  ;;  %s1408_s13 = sand.u32 (!%p1393_p5), 1, %s1207_s12  }
  0x3f   : > { %s900_s26 = sshll.u32 (!%p1393_p5), %s1408_s13, 4  ;;  %s372_s28 = scalar_lea.sflag (!%p1393_p5), [#allocation4], %s1408_s13 }
  0x40   : > { %s375_s21 = scalar_lea.vmem (!%p1393_p5), [#allocation3], %s900_s26 }
  0x43   : > { %1186 = dma.done.wait (%p1339_p8), %s372_s28, 256  }
  0x44   : > { %1188 = vsyncadd (%p1339_p8), %s372_s28, 4294967040  ;;  %s381_s9 = scalar_lea.sflag [#allocation7], %s1408_s13  ;;  %s384_s11 = scalar_lea.vmem [#allocation6], %s900_s26 }
  0x45   : > { %1190 = dma.done.wait (%p1339_p8), %s381_s9, 256  }
  0x46   : > { %1192 = vsyncadd (%p1339_p8), %s381_s9, 4294967040  ;;  %v1229_v0 = vmov 0.0   ;;  %vm1230_vm0 = vmmov 0   ;;  %v1231_v1 = vmov 0   ;;  %v433_v2 = vld [vmem:[%s375_s21 + $0x8] sm:$0xff]  ;;  %v432_v3 = vld [vmem:[%s375_s21] sm:$0xff]  ;;  %v669_v10 = vlaneseq }
  0x47   : > { %923 = vmatprep.subr.mxu0 %v1229_v0  ;;  %930 = vmatprep.subr.mxu1 %v1229_v0  ;;  %v436_v4 = vld [vmem:[%s1565_s2] sm:$0xff]  ;;  %vm443_vm1 = vcmask 130048   ;;  %v435_v6 = vld [vmem:[%s384_s11 + $0x8] sm:$0xff]  ;;  %s519_s20 = sld [smem:[#allocation2]]  ;;  %s902_s18 = sshll.u32 %s1408_s13, 3 }
  0x48   : > { %927 = vmatprep.mubr.msk.f32.mxu0 %vm1230_vm0, %v1229_v0  ;;  %934 = vmatprep.mubr.msk.f32.mxu1 %vm1230_vm0, %v1229_v0  ;;  %v518_v5 = vld [vmem:[%s1567_s4] sm:$0x1]  ;;  %s682_s10 = sand.u32 1, %s1319_s6   ;;  %s908_s0 = sshll.u32 %s1215_s14, 4  ;;  %v670_v12 = vand.u32 127, %v669_v10 }
  0x49   : > { %1026 = vset.pattern.permute.xlu0 %v1231_v1  ;;  %924 = vmatpush3.msra.mxu0 %v433_v2  ;;  %v434_v7 = vld [vmem:[%s384_s11] sm:$0xff]  ;;  %s907_s26 = sshll.u32 %s1215_s14, 7  ;;  %s419_s28 = scalar_lea.vmem [#allocation8], %s902_s18 }
  0x4a   : > { %931 = vmatpush3.msra.mxu1 %v433_v2  ;;  %925 = vmatprep.subr.mxu0 %v1229_v0  ;;  %v437_v8 = vld [vmem:[%s1566_s3] sm:$0xff]  ;;  %s700_s21 = sshll.u32 %s419_s28, 4  ;;  %s1580_s9 = scalar_lea.vmem [#allocation11], %s1408_s13  ;;  %vm674_vm2 = vcmp.lt.s32.totalorder %v670_v12, 64  ;;  %s1452_s21 = int_to_ptr.vmem [resolvable:$true] %s700_s21 }
  0x4b   : > { %932 = vmatprep.subr.mxu1 %v1229_v0  ;;  %926 = vmatpush3.msra.mxu0 %v432_v3  ;;  %v595_v9 = vld [vmem:[%s1568_s5] sm:$0x1]  ;;  %s728_s11 = sshll.u32 %s1580_s9, 4  ;;  %s425_s17 = scalar_lea.vmem [#allocation9], %s1408_s13  ;;  %s1461_s11 = int_to_ptr.vmem [resolvable:$true] %s728_s11 }
  0x4c   : > { %933 = vmatpush3.msra.mxu1 %v432_v3  ;;  %928 = vmatmul.mubr.msk.f32.vlgmr.msra.gmra.mxu0 %vm443_vm1, %v436_v4  ;;  %s714_s25 = sshll.u32 %s425_s17, 4  ;;  %s1450_s19 = scalar_lea.hbm %s1570_s7, %s907_s26  ;;  %s1459_s25 = int_to_ptr.vmem [resolvable:$true] %s714_s25 }
  0x4d   : > { %937 = vmatprep.subr.mxu0 %v1229_v0  ;;  %935 = vmatmul.mubr.msk.f32.vlgmr.msra.gmra.mxu1 %vm443_vm1, %v518_v5  ;;  %v520_v13 = vstv %s519_s20  ;;  %s1457_s24 = scalar_lea.hbm %s1571_s8, %s908_s0  ;;  %s1596_s18 = sld [smem:[#allocation22_spill]] }
  0x4e   : > { %938 = vmatpush3.msra.mxu0 %v435_v6  ;;  %941 = vmatprep.mubr.msk.f32.mxu0 %vm1230_vm0, %v1229_v0  ;;  %s678_s22 = scalar_lea.sflag [#allocation5], %s1408_s13  ;;  %s1083_s27 = scalar_lea.vmem %s1452_s21, 128 }
  0x4f   : > { %939 = vmatprep.subr.mxu0 %v1229_v0  ;;  %440 = vperm.xlu0 %1026, %v437_v8   ;;  %p1084_p8 = scmp.ne.s32.totalorder %s1452_s21, %s1083_s27  ;;  %s1232_s14 = smov [#allocation8]  }
  0x50   : > { %940 = vmatpush3.msra.mxu0 %v434_v7  ;;  %s1087_s29 = sshll.u32 %s1232_s14, 4  ;;  %s1088_s29 = int_to_ptr.vmem [resolvable:$false] %s1087_s29 }
  0x51   : > { %942 = vmatmul.mubr.msk.f32.vlgmr.msra.gmra.mxu0 %vm443_vm1, %v595_v9  ;;  %p1085_p0 = pnand %p1084_p8, %p1343_p9  ;;  %p1090_p5 = scmp.lt.s32.totalorder %s1452_s21, %s1088_s29 }
  0x53   : > { %s1466_s26 = scalar_lea.hbm %s1596_s18, %s908_s0  ;;  %p1086_p2 = pneg %p1085_p0 }
  0xca   : > { %v441_v11 = vpop.permute.xlu0 %440 }
 0x10c   : > { %v513_v14 = vpop.f32.mrf.mxu0 }
 0x10d   : > { %v514_v15 = vadd.f32 %v513_v14, %v441_v11  ;;  %v590_v16 = vpop.f32.mrf.mxu1 }
 0x10e   : > { %v591_v17 = vadd.f32 %v590_v16, %v520_v13  ;;  %v929_v18 = vpop.f32.mrf.mxu0 }
 0x10f   : > { %517 = vst [vmem:[%s419_s28] sm:$0xff] %v514_v15  ;;  %v936_v19 = vpop.f32.mrf.mxu1  ;;  %s1089_s28 = scalar_lea.vmem %s1088_s29, 256 }
 0x110   : > { %594 = vst [vmem:[%s425_s17] sm:$0x1] %v591_v17  ;;  %p1091_p6 = scmp.lt.s32.totalorder %s1089_s28, %s1083_s27 }
 0x111   : > { %v665_v20 = vpop.f32.mrf.mxu0 }
 0x112   : > { %p1092_p4 = por %p1091_p6, %p1090_p5 }
 0x114   : > { %p1093_p7 = pnand %p1092_p4, %p1086_p2 }
 0x116   : > { %1096 = shalt.err (!%p1093_p7)
}
 0x117   : > { %s1097_s0 = scalar_lea.hbm %s1450_s19, 128  ;;  %s1101_s20 = scalar_lea.hbm %s1570_s7, 256 }
 0x118   : > { %p1098_p10 = scmp.ne.s32.totalorder %s1450_s19, %s1097_s0  ;;  %p1102_p3 = scmp.lt.s32.totalorder %s1450_s19, %s1570_s7 }
 0x119   : > { %p1103_p8 = scmp.lt.s32.totalorder %s1101_s20, %s1097_s0 }
 0x11a   : > { %p1099_p1 = pnand %p1098_p10, %p1343_p9 }
 0x11b   : > { %p1104_p0 = por %p1103_p8, %p1102_p3 }
 0x11c   : > { %p1100_p13 = pneg %p1099_p1 }
 0x11e   : > { %p1105_p2 = pnand %p1104_p0, %p1100_p13 }
 0x120   : > { %1108 = shalt.err (!%p1105_p2)
}
 0x121   : > { %948 = dma.vmem_to_hbm [thread:$0]  (%p1343_p9), %s1452_s21, 128, %s1450_s19, %s678_s22   ;;  %v675_v21 = vsel %vm674_vm2, %v665_v20, -1e+30 }
 0x122   : > { %s1492_s27 = scalar_lea.sflag [#allocation10], %s682_s10  ;;  %s1109_s9 = scalar_lea.vmem %s1459_s25, 16 }
 0x123   : > { %p1110_p5 = scmp.ne.s32.totalorder %s1459_s25, %s1109_s9  ;;  %s1233_s29 = smov [#allocation9]  }
 0x124   : > { %s1113_s28 = sshll.u32 %s1233_s29, 4  ;;  %s1114_s28 = int_to_ptr.vmem [resolvable:$false] %s1113_s28 }
 0x125   : > { %p1111_p6 = pnand %p1110_p5, %p1343_p9  ;;  %s1115_s0 = scalar_lea.vmem %s1114_s28, 32 }
 0x126   : > { %p1116_p7 = scmp.lt.s32.totalorder %s1459_s25, %s1114_s28  ;;  %p1117_p10 = scmp.lt.s32.totalorder %s1115_s0, %s1109_s9 }
 0x127   : > { %p1112_p4 = pneg %p1111_p6 }
 0x128   : > { %p1118_p1 = por %p1117_p10, %p1116_p7 }
 0x12a   : > { %p1119_p13 = pnand %p1118_p1, %p1112_p4 }
 0x12c   : > { %1122 = shalt.err (!%p1119_p13)
}
 0x12d   : > { %s1123_s6 = scalar_lea.hbm %s1457_s24, 16  ;;  %s1127_s19 = scalar_lea.hbm %s1571_s8, 32 }
 0x12e   : > { %p1124_p3 = scmp.ne.s32.totalorder %s1457_s24, %s1123_s6  ;;  %p1128_p2 = scmp.lt.s32.totalorder %s1457_s24, %s1571_s8 }
 0x12f   : > { %p1129_p5 = scmp.lt.s32.totalorder %s1127_s19, %s1123_s6 }
 0x130   : > { %p1125_p8 = pnand %p1124_p3, %p1343_p9 }
 0x131   : > { %p1130_p6 = por %p1129_p5, %p1128_p2 }
 0x132   : > { %p1126_p0 = pneg %p1125_p8 }
 0x134   : > { %p1131_p4 = pnand %p1130_p6, %p1126_p0 }
 0x136   : > { %1134 = shalt.err (!%p1131_p4)
}
 0x137   : > { %949 = dma.vmem_to_hbm [thread:$0]  (%p1343_p9), %s1459_s25, 16, %s1457_s24, %s1492_s27   ;;  %v943_v22 = vpop.f32.mrf.mxu0 }
 0x138   : > { %s1597_s30 = scalar_lea.vmem [#allocation11], %s1408_s13  ;;  %s1135_s20 = scalar_lea.vmem %s1461_s11, 16 }
 0x139   : > { %676 = vst [vmem:[%s1597_s30] sm:$0x1] %v675_v21  ;;  %p1136_p7 = scmp.ne.s32.totalorder %s1461_s11, %s1135_s20  ;;  %s1234_s14 = smov [#allocation11]  }
 0x13a   : > { %s1139_s9 = sshll.u32 %s1234_s14, 4  ;;  %s1140_s9 = int_to_ptr.vmem [resolvable:$false] %s1139_s9 }
 0x13b   : > { %p1137_p10 = pnand %p1136_p7, %p1343_p9  ;;  %s1141_s29 = scalar_lea.vmem %s1140_s9, 32 }
 0x13c   : > { %p1142_p13 = scmp.lt.s32.totalorder %s1461_s11, %s1140_s9  ;;  %p1143_p3 = scmp.lt.s32.totalorder %s1141_s29, %s1135_s20 }
 0x13d   : > { %p1138_p1 = pneg %p1137_p10 }
 0x13e   : > { %p1144_p8 = por %p1143_p3, %p1142_p13 }
 0x140   : > { %p1145_p0 = pnand %p1144_p8, %p1138_p1 }
 0x142   : > { %1148 = shalt.err (!%p1145_p0)
}
 0x143   : > { %s1149_s13 = scalar_lea.hbm %s1466_s26, 16  ;;  %s1153_s28 = scalar_lea.hbm %s1596_s18, 32 }
 0x144   : > { %p1150_p2 = scmp.ne.s32.totalorder %s1466_s26, %s1149_s13  ;;  %p1154_p4 = scmp.lt.s32.totalorder %s1466_s26, %s1596_s18 }
 0x145   : > { %p1155_p7 = scmp.lt.s32.totalorder %s1153_s28, %s1149_s13 }
 0x146   : > { %p1151_p5 = pnand %p1150_p2, %p1343_p9 }
 0x147   : > { %p1156_p10 = por %p1155_p7, %p1154_p4 }
 0x148   : > { %p1152_p6 = pneg %p1151_p5 }
 0x14a   : > { %p1157_p1 = pnand %p1156_p10, %p1152_p6 }
 0x14c   : > { %1160 = shalt.err (!%p1157_p1)
}
 0x14d   : > { %950 = dma.vmem_to_hbm [thread:$0]  (%p1343_p9), %s1461_s11, 16, %s1466_s26, %s1492_s27  }
 0x14e PF: > { %s1598_s10 = sld [smem:[#allocation16_spill]]  ;;  %p962_p13 = pnand %p892_p12, %p1352_p11 }
 0x150   : > { %p963_p3 = pneg %p962_p13 }
 0x154   : > { %s740_s19 = sand.u32 1, %s1598_s10  }
 0x155   : > { %s741_s22 = scalar_lea.sflag [#allocation5], %s740_s19 }
 0x156   : > { %1194 = dma.done.wait (%p963_p3), %s741_s22, 128  }
 0x157   : > { %1196 = vsyncadd (%p963_p3), %s741_s22, 4294967168  ;;  %s1600_s17 = sadd.s32 4294967294, %s1223_s16  }
 0x158   : > { %s749_s30 = sand.u32 1, %s1600_s17  }
 0x159   : > { %s750_s23 = scalar_lea.sflag [#allocation10], %s749_s30 }
 0x15a   : > { %1198 = dma.done.wait (%p963_p3), %s750_s23, 32  }
 0x15b   : > { %1200 = vsyncadd (%p963_p3), %s750_s23, 4294967264  ;;  %s33_s16 = sadd.s32 1, %s1223_s16   ;;  %s1601_s26 = sld [smem:[#allocation17_spill]] }
 0x15c   : > { %p30_p9 = scmp.ge.s32.totalorder %s33_s16, 4   ;;  %s1602_s13 = sld [smem:[#allocation19_spill]] }
 0x15d   : > { %s1603_s27 = sld [smem:[#allocation18_spill]]  ;;  %s1604_s11 = smov %s1207_s12 }
 0x15e   : > { %s1606_s14 = smov %s1219_s15 }
 0x15f   :  { %32 = sbr.rel (!%p30_p9) target bundleno = 14 (0xe), region = 138 }
 0x161   : > { %s1605_s12 = smov %s1601_s26 }
 0x163   : > { %s1607_s15 = smov %s1603_s27 }
 0x164   :  { %762 = vsyncpa [#allocation4], 1 }
 0x165   :  { %764 = vsyncpa [#allocation4 + $0x1], 1 }
 0x166   :  { %765 = vsyncpa [#allocation7], 1 }
 0x167   :  { %767 = vsyncpa [#allocation7 + $0x1], 1 }
 0x168   :  { %768 = vsyncpa [#allocation5], 1 }
 0x169   :  { %770 = vsyncpa [#allocation5 + $0x1], 1 }
 0x16a   :  { %771 = vsyncpa [#allocation10], 1 }
 0x16b   :  { %773 = vsyncpa [#allocation10 + $0x1], 1 }

</bundles_post_ra>
